<compile_context>
chip_gen: v7x
topology: tpu7x:2x2x1
jax: 0.10.0
libtpu: 0.0.40
codegen_flags: <defaults>
</compile_context>

<pallas_src>
import functools

import jax
import jax.numpy as jnp
import numpy as np
from jax.experimental import pallas as pl
from jax.experimental.pallas import tpu as pltpu


_SMALL_K = 16      # Cin at or below this -> f32 VPU path (no MXU, no bf16 cast)
_LANE = 128
_TS_TARGET = 2048  # upper bound on the spatial (lane) tile


def _round_up(x: int, m: int) -> int:
    return ((x + m - 1) // m) * m


def _vmem_capacity_bytes() -> int:
    """Physical VMEM per TensorCore; conservative fallback if the query fails."""
    try:
        info = pltpu.get_tpu_info()
        cap = int(getattr(info, "vmem_capacity_bytes", 0))
        if cap > 0:
            return cap
    except Exception:
        pass
    return 64 << 20  # v7x per-TC VMEM (the smallest across v5e/v6e/v7x)


def _select_spatial_tile(s, bytes_per_col, resident_bytes, budget, batch):
    """Pick the spatial (lane) tile size.

    Preference: fits VMEM budget > minimal spatial padding > even number of grid
    steps (balanced megacore split on v7x) > larger tile (fewer per-step
    overheads / bigger DMAs).
    """
    max_ts = min(_TS_TARGET, _round_up(s, _LANE))
    best_key, best = None, None
    for ts in range(_LANE, max_ts + 1, _LANE):
        footprint = resident_bytes + 2 * bytes_per_col * ts   # 2x = double buffering
        s_pad = _round_up(s, ts)
        n_steps = batch * (s_pad // ts)
        odd = 1 if (n_steps > 1 and n_steps % 2 == 1) else 0
        if footprint <= budget:
            key = (0, s_pad - s, odd, -ts)
        else:                      # nothing fits: fall back to smallest footprint
            key = (1, ts)
        if best_key is None or key < best_key:
            best_key, best = key, (ts, s_pad, footprint)
    return best


def _conv1x1_kernel(x_ref, w_ref, b_ref, o_ref, *, use_mxu, compute_dtype):
    """One (Coff, ts) output tile of  Y = W @ X + bias  for a single batch item.

    x_ref : (1, Cin, ts)   streamed input tile, native dtype (cast here, in VMEM)
    w_ref : (Coff, Cin)    resident weight
    b_ref : (Coff, 1)      resident bias (f32)
    o_ref : (1, Coff, ts)  lane-dense output tile
    """
    x = x_ref[0].astype(compute_dtype)                          # (Cin, ts)
    if use_mxu:
        acc = jnp.dot(w_ref[...], x, preferred_element_type=jnp.float32)
    else:
        # Tiny contraction: outer-product FMA on the VPU (f32-exact).  The MXU
        # would run at a few % K-utilisation and the kernel is store-bound.
        w = w_ref[...]
        acc = jnp.zeros((w.shape[0], x.shape[1]), jnp.float32)
        for ci in range(w.shape[1]):
            acc = acc + w[:, ci:ci + 1] * x[ci:ci + 1, :]
    o_ref[0] = (acc + b_ref[...]).astype(o_ref.dtype)


def _conv1x1_gemm(x3d, weight, bias, out_dtype):
    """Per-batch GEMM  Y[b] = W @ X[b] + bias  with fused bias/cast epilogue.

    x3d    : (B, Cin, S)   NCTHW video collapsed over (t, h, w)  [free reshape]
    weight : (Coff, Cin)
    bias   : (Coff,)
    returns: (B, Coff, S)
    """
    batch, cin, s = x3d.shape
    co_ff = weight.shape[0]

    use_mxu = cin > _SMALL_K
    # NOTE: the MXU path feeds bf16 operands (f32 inputs are rounded in-kernel);
    # callers needing f32-exact conv for large Cin should add an f32 MXU path.
    compute_dtype = jnp.bfloat16 if use_mxu else jnp.float32
    w_op = weight.astype(compute_dtype)                       # (Coff, Cin), resident
    bias_op = bias.astype(jnp.float32).reshape(co_ff, 1)      # (Coff, 1),  resident

    in_isz = np.dtype(x3d.dtype).itemsize
    out_isz = np.dtype(out_dtype).itemsize
    w_isz = np.dtype(compute_dtype).itemsize

    # VMEM accounting: resident operands (double-buffered by default even though
    # their block index never changes) + double-buffered streamed X / Y tiles.
    resident = 2 * (co_ff * cin * w_isz + co_ff * 4)
    bytes_per_col = cin * in_isz + co_ff * out_isz
    cap = _vmem_capacity_bytes()
    budget = min(int(cap * 0.75), 96 << 20)      # ~48 MiB on v7x, ~96 MiB on v5e/v6e
    ts, s_pad, footprint = _select_spatial_tile(s, bytes_per_col, resident, budget, batch)

    vmem_limit = max(32 << 20, footprint + (8 << 20))
    hard_cap = int(cap * 0.95)
    if vmem_limit > hard_cap:
        # TODO(synk): switch to a Cin-tiled accumulator kernel instead of
        # squeezing the scoped-VMEM limit.
        vmem_limit = max(hard_cap, footprint + (2 << 20))

    if s_pad != s:
        x3d = jnp.pad(x3d, ((0, 0), (0, 0), (0, s_pad - s)))

    grid = (batch, s_pad // ts)

    cost = pl.CostEstimate(
        flops=2 * batch * co_ff * cin * s_pad,
        transcendentals=0,
        bytes_accessed=(batch * cin * s_pad * in_isz + co_ff * cin * w_isz
                        + co_ff * 4 + batch * co_ff * s_pad * out_isz),
    )

    kernel = functools.partial(_conv1x1_kernel, use_mxu=use_mxu,
                               compute_dtype=compute_dtype)

    y = pl.pallas_call(
        kernel,
        out_shape=jax.ShapeDtypeStruct((batch, co_ff, s_pad), out_dtype),
        grid_spec=pltpu.PrefetchScalarGridSpec(
            num_scalar_prefetch=0,
            grid=grid,
            in_specs=[
                pl.BlockSpec((1, cin, ts), lambda bi, si: (bi, 0, si)),  # X: streamed
                pl.BlockSpec((co_ff, cin), lambda bi, si: (0, 0)),       # W: resident
                pl.BlockSpec((co_ff, 1), lambda bi, si: (0, 0)),         # bias: resident
            ],
            out_specs=pl.BlockSpec((1, co_ff, ts), lambda bi, si: (bi, 0, si)),
        ),
        compiler_params=pltpu.CompilerParams(
            dimension_semantics=("parallel", "parallel"),
            vmem_limit_bytes=int(vmem_limit),
        ),
        cost_estimate=cost,
    )(x3d, w_op, bias_op)

    if s_pad != s:
        y = y[:, :, :s]
    return y


def depth_to_space_upsample(x, weight, bias, factor):
    """Forward pass of DepthToSpaceUpsample.

    x      : (b, c_in, t, h, w)
    weight : (c_out * factor**2, c_in)   (Conv2d k=1 weight, squeezed)
    bias   : (c_out * factor**2,)
    returns: (b, c_out, t, h*factor, w*factor)
    """
    b, cin, t, h, w = x.shape
    co_ff = weight.shape[0]
    cout = co_ff // (factor * factor)
    s = t * h * w

    # NCTHW -> (b, Cin, S): contiguous (free) collapse; no HBM transpose pass.
    x3d = x.reshape(b, cin, s)
    y = _conv1x1_gemm(x3d, weight, bias, x.dtype)             # (b, Coff, S)

    # Depth -> space pixel shuffle: (b, co*F*F, t, h, w) -> (b, co, t, h*F, w*F),
    # matching einops 'b (c p q) h w -> b c (h p) (w q)'.
    # TODO(synk): fuse this interleave into the kernel's output store.
    f = factor
    y = y.reshape(b, cout, f, f, t, h, w)
    y = jnp.transpose(y, (0, 1, 4, 5, 2, 6, 3))               # (b, co, t, h, p, w, q)
    return y.reshape(b, cout, t, h * f, w * f)


def _reference(x, weight, bias, factor, *, round_to_bf16):
    """NumPy reference for the module's forward pass."""
    xn = np.asarray(x, dtype=np.float32)
    wn = np.asarray(weight, dtype=np.float32)
    bn = np.asarray(bias, dtype=np.float32)
    if round_to_bf16:  # mimic the kernel's bf16 MXU operand rounding
        xn = np.asarray(jnp.asarray(xn).astype(jnp.bfloat16).astype(jnp.float32))
        wn = np.asarray(jnp.asarray(wn).astype(jnp.bfloat16).astype(jnp.float32))
    b, cin, t, h, w = xn.shape
    f = factor
    cout = wn.shape[0] // (f * f)
    conv = np.einsum("bcthw,oc->bothw", xn, wn) + bn[None, :, None, None, None]
    conv = conv.reshape(b, cout, f, f, t, h, w)
    return conv.transpose(0, 1, 4, 5, 2, 6, 3).reshape(b, cout, t, h * f, w * f)


if __name__ == "__main__":
    key = jax.random.PRNGKey(0)
    k = jax.random.split(key, 6)

    # --- config 1: tiny Cin -> f32 VPU path --------------------------------
    b, cin, t, h, w = 2, 4, 3, 8, 8
    cout, factor = 4, 2
    co_ff = cout * factor * factor
    x = jax.random.normal(k[0], (b, cin, t, h, w), dtype=jnp.float32)
    weight = jax.random.normal(k[1], (co_ff, cin), dtype=jnp.float32) * 0.1
    bias = jax.random.normal(k[2], (co_ff,), dtype=jnp.float32) * 0.1

    fwd = jax.jit(functools.partial(depth_to_space_upsample, factor=factor))
    out = jax.block_until_ready(fwd(x, weight, bias))
    assert out.shape == (b, cout, t, h * factor, w * factor)
    np.testing.assert_allclose(
        np.asarray(out), _reference(x, weight, bias, factor, round_to_bf16=False),
        rtol=1e-4, atol=1e-4)

    # --- config 2: larger Cin -> bf16 MXU path ------------------------------
    b2, cin2, t2, h2, w2 = 1, 64, 2, 8, 8
    cout2, factor2 = 8, 2
    co_ff2 = cout2 * factor2 * factor2
    x2 = jax.random.normal(k[3], (b2, cin2, t2, h2, w2), dtype=jnp.float32)
    weight2 = jax.random.normal(k[4], (co_ff2, cin2), dtype=jnp.float32) * 0.1
    bias2 = jax.random.normal(k[5], (co_ff2,), dtype=jnp.float32) * 0.1

    fwd2 = jax.jit(functools.partial(depth_to_space_upsample, factor=factor2))
    out2 = jax.block_until_ready(fwd2(x2, weight2, bias2))
    assert out2.shape == (b2, cout2, t2, h2 * factor2, w2 * factor2)
    np.testing.assert_allclose(
        np.asarray(out2), _reference(x2, weight2, bias2, factor2, round_to_bf16=True),
        rtol=2e-2, atol=2e-2)

    print("KERNEL_OK")
</pallas_src>

<mosaic_0001>
module attributes {stable_mosaic.version = 11 : i64} {
  func.func @_conv1x1_kernel(%arg0: i32, %arg1: i32, %arg2: memref<1x4x256xf32, #tpu.memory_space<vmem>>, %arg3: memref<16x4xf32, #tpu.memory_space<vmem>>, %arg4: memref<16x1xf32, #tpu.memory_space<vmem>>, %arg5: memref<1x16x256xf32, #tpu.memory_space<vmem>>) attributes {dimension_semantics = [#tpu.dimension_semantics<parallel>, #tpu.dimension_semantics<parallel>], iteration_bounds = array<i64: 2, 1>, scalar_prefetch = 0 : i64, scratch_operands = 0 : i64, tpu.core_type = #tpu.core_type<tc>, window_params = [{transform_indices = @transform_0, window_bounds = array<i64: 1, 4, 256>}, {pipeline_mode = #tpu.pipeline_mode<synchronous>, transform_indices = @transform_1, window_bounds = array<i64: 16, 4>}, {pipeline_mode = #tpu.pipeline_mode<synchronous>, transform_indices = @transform_2, window_bounds = array<i64: 16, 1>}, {transform_indices = @transform_3, window_bounds = array<i64: 1, 16, 256>}]} {
    %c0 = arith.constant 0 : index
    %c0_0 = arith.constant 0 : index
    %c0_1 = arith.constant 0 : index
    %0 = vector.load %arg2[%c0, %c0_0, %c0_1] : memref<1x4x256xf32, #tpu.memory_space<vmem>>, vector<1x4x256xf32>
    %1 = vector.shape_cast %0 : vector<1x4x256xf32> to vector<4x256xf32>
    %c0_2 = arith.constant 0 : index
    %c0_3 = arith.constant 0 : index
    %2 = vector.load %arg3[%c0_2, %c0_3] : memref<16x4xf32, #tpu.memory_space<vmem>>, vector<16x4xf32>
    %cst = arith.constant 0.000000e+00 : f32
    %3 = vector.broadcast %cst : f32 to vector<16x256xf32>
    %4 = vector.extract_strided_slice %2 {offsets = [0, 0], sizes = [16, 1], strides = [1, 1]} : vector<16x4xf32> to vector<16x1xf32>
    %5 = vector.extract_strided_slice %1 {offsets = [0, 0], sizes = [1, 256], strides = [1, 1]} : vector<4x256xf32> to vector<1x256xf32>
    %6 = vector.broadcast %4 : vector<16x1xf32> to vector<16x256xf32>
    %7 = vector.broadcast %5 : vector<1x256xf32> to vector<16x256xf32>
    %8 = arith.mulf %6, %7 : vector<16x256xf32>
    %9 = arith.addf %3, %8 : vector<16x256xf32>
    %10 = vector.extract_strided_slice %2 {offsets = [0, 1], sizes = [16, 1], strides = [1, 1]} : vector<16x4xf32> to vector<16x1xf32>
    %11 = vector.extract_strided_slice %1 {offsets = [1, 0], sizes = [1, 256], strides = [1, 1]} : vector<4x256xf32> to vector<1x256xf32>
    %12 = vector.broadcast %10 : vector<16x1xf32> to vector<16x256xf32>
    %13 = vector.broadcast %11 : vector<1x256xf32> to vector<16x256xf32>
    %14 = arith.mulf %12, %13 : vector<16x256xf32>
    %15 = arith.addf %9, %14 : vector<16x256xf32>
    %16 = vector.extract_strided_slice %2 {offsets = [0, 2], sizes = [16, 1], strides = [1, 1]} : vector<16x4xf32> to vector<16x1xf32>
    %17 = vector.extract_strided_slice %1 {offsets = [2, 0], sizes = [1, 256], strides = [1, 1]} : vector<4x256xf32> to vector<1x256xf32>
    %18 = vector.broadcast %16 : vector<16x1xf32> to vector<16x256xf32>
    %19 = vector.broadcast %17 : vector<1x256xf32> to vector<16x256xf32>
    %20 = arith.mulf %18, %19 : vector<16x256xf32>
    %21 = arith.addf %15, %20 : vector<16x256xf32>
    %22 = vector.extract_strided_slice %2 {offsets = [0, 3], sizes = [16, 1], strides = [1, 1]} : vector<16x4xf32> to vector<16x1xf32>
    %23 = vector.extract_strided_slice %1 {offsets = [3, 0], sizes = [1, 256], strides = [1, 1]} : vector<4x256xf32> to vector<1x256xf32>
    %24 = vector.broadcast %22 : vector<16x1xf32> to vector<16x256xf32>
    %25 = vector.broadcast %23 : vector<1x256xf32> to vector<16x256xf32>
    %26 = arith.mulf %24, %25 : vector<16x256xf32>
    %27 = arith.addf %21, %26 : vector<16x256xf32>
    %c0_4 = arith.constant 0 : index
    %c0_5 = arith.constant 0 : index
    %28 = vector.load %arg4[%c0_4, %c0_5] : memref<16x1xf32, #tpu.memory_space<vmem>>, vector<16x1xf32>
    %29 = vector.broadcast %28 : vector<16x1xf32> to vector<16x256xf32>
    %30 = arith.addf %27, %29 : vector<16x256xf32>
    %c0_6 = arith.constant 0 : index
    %c0_7 = arith.constant 0 : index
    %c0_8 = arith.constant 0 : index
    %31 = vector.load %arg5[%c0_6, %c0_7, %c0_8] : memref<1x16x256xf32, #tpu.memory_space<vmem>>, vector<1x16x256xf32>
    %32 = vector.shape_cast %31 : vector<1x16x256xf32> to vector<16x256xf32>
    %33 = vector.shape_cast %30 : vector<16x256xf32> to vector<1x16x256xf32>
    tpu.vector_store %arg5[%c0_6, %c0_7, %c0_8], %33 {strides = array<i32>} : memref<1x16x256xf32, #tpu.memory_space<vmem>>, vector<1x16x256xf32>,
    return
  }
  func.func @transform_0(%arg0: i32, %arg1: i32) -> (i32, i32, i32) {
    %c0_i32 = arith.constant 0 : i32
    %c0_i32_0 = arith.constant 0 : i32
    return %arg0, %c0_i32, %arg1 : i32, i32, i32
  }
  func.func @transform_1(%arg0: i32, %arg1: i32) -> (i32, i32) {
    %c0_i32 = arith.constant 0 : i32
    %c0_i32_0 = arith.constant 0 : i32
    %c0_i32_1 = arith.constant 0 : i32
    return %c0_i32, %c0_i32_0 : i32, i32
  }
  func.func @transform_2(%arg0: i32, %arg1: i32) -> (i32, i32) {
    %c0_i32 = arith.constant 0 : i32
    %c0_i32_0 = arith.constant 0 : i32
    %c0_i32_1 = arith.constant 0 : i32
    return %c0_i32, %c0_i32_0 : i32, i32
  }
  func.func @transform_3(%arg0: i32, %arg1: i32) -> (i32, i32, i32) {
    %c0_i32 = arith.constant 0 : i32
    %c0_i32_0 = arith.constant 0 : i32
    return %arg0, %c0_i32, %arg1 : i32, i32, i32
  }
}

</mosaic_0001>

<bundles_post_ra>
// kernel: depth_to_space_upsample.1
= control target key start
LH: loop header
LB: loop body
LE: loop exit
PB: predicated region body
PF: predicated region fallthrough
CT: control target
= control target key end

     0   :  { %s556_s12 = smov 0   ;;  %s558_s13 = smov 0   ;;  %s609_s0 = inlined_call_operand.vmem [shape: f32[2,4,256], index: 0, kind: input, shape index: {}]   ;;  %s610_s1 = inlined_call_operand.vmem [shape: f32[16,4], index: 1, kind: input, shape index: {}]   ;;  %s611_s2 = inlined_call_operand.vmem [shape: f32[16,1], index: 2, kind: input, shape index: {}]   ;;  %s612_s3 = inlined_call_operand.vmem [shape: f32[2,16,256], index: 3, kind: output, shape index: {}]  }
   0x1   :  { %s560_s14 = smov 0  }
   0x2 LB: > { %s25_s15 = sadd.s32 1, %s526_s13  ;;  %p463_p0 = scmp.ge.s32.totalorder %s530_s14, 1  ;;  %s530_s14 = sphi %s560_s14, %s13_s14   ;;  %s526_s13 = sphi %s558_s13, %s614_s13   ;;  %s522_s12 = sphi %s556_s12, %s613_s12  }
   0x3   : > { %p27_p1 = scmp.ge.s32.totalorder %s25_s15, 2  ;;  %p158_p2 = scmp.lt.s32.totalorder %s530_s14, 3 }
   0x5   : > { %s616_s15 = smov (%p27_p1, %s25_s15), 0  ;;  %p159_p3 = pnand %p463_p0, %p158_p2 }
   0x6   : > { %v211_v0 = vld [vmem:[%s610_s1] sm:$0xff] (!%p159_p3)  ;;  %v532_v1 = vmov (!%p159_p3), 1   ;;  %v533_v2 = vmov (!%p159_p3), 0   ;;  %v212_v3 = vld [vmem:[%s610_s1 + $0x8] sm:$0xff] (!%p159_p3)  ;;  %v534_v4 = vmov (!%p159_p3), 2   ;;  %v535_v5 = vmov (!%p159_p3), 3  }
   0x7   : > { %162 = sbr.rel (%p159_p3) target bundleno = 162 (0xa2), region = 32  ;;  %501 = vset.pattern.permute.xlu1 (!%p159_p3), %v532_v1  ;;  %500 = vset.pattern.permute.xlu0 (!%p159_p3), %v533_v2  ;;  %v352_v6 = vld [vmem:[%s611_s2] sm:$0xff] (!%p159_p3)  ;;  %v353_v7 = vld [vmem:[%s611_s2 + $0x8] sm:$0xff] (!%p159_p3)  ;;  %p191_p4 = scmp.lt.s32.totalorder (!%p159_p3), %s522_s12, 1  ;;  %v224_v8 = vlaneseq (!%p159_p3) }
   0x8   : > { %251 = vperm.xlu1 (!%p159_p3), %501, %v211_v0   ;;  %215 = vperm.xlu0 (!%p159_p3), %500, %v211_v0  }
   0x9   : > { %v225_v9 = vshrl.u32 (!%p159_p3), %v224_v8, 7 }
   0xb   : > { %v260_v10 = vsub.s32 (!%p159_p3), 1, %v225_v9  ;;  %v264_v11 = vsub.s32 (!%p159_p3), 5, %v225_v9  ;;  %v226_v12 = vsub.s32 (!%p159_p3), 0, %v225_v9  ;;  %v230_v13 = vsub.s32 (!%p159_p3), 4, %v225_v9 }
   0xc   : > { %255 = vperm.xlu1 (!%p159_p3), %501, %v212_v3   ;;  %220 = vperm.xlu0 (!%p159_p3), %500, %v212_v3   ;;  %v294_v15 = vsub.s32 (!%p159_p3), 2, %v225_v9  ;;  %v298_v16 = vsub.s32 (!%p159_p3), 6, %v225_v9  ;;  %v328_v25 = vsub.s32 (!%p159_p3), 3, %v225_v9  ;;  %v332_v26 = vsub.s32 (!%p159_p3), 7, %v225_v9 }
   0xe   : > { %s618_s12 = smov (!%p191_p4, %s522_s12), 1 }
   0xf   : > { %s470_s24 = sshll.u32 %s618_s12, 3  ;;  %s471_s28 = sshll.u32 %s618_s12, 5 }
  0x10   : > { %503 = vset.pattern.permute.xlu1 %v534_v4  ;;  %502 = vset.pattern.permute.xlu0 %v534_v4  ;;  %s198_s27 = scalar_lea.vmem %s609_s0, %s470_s24  ;;  %s208_s4 = scalar_lea.vmem %s612_s3, %s471_s28 }
  0x11   : > { %289 = vperm.xlu1 %503, %v212_v3   ;;  %285 = vperm.xlu0 %502, %v211_v0   ;;  %v210_v14 = vld [vmem:[%s198_s27] sm:$0xff] }
  0x12   : > { %v261_v19 = vrot.slane %v210_v14, %v260_v10  ;;  %v265_v20 = vrot.slane %v210_v14, %v264_v11  ;;  %v227_v21 = vrot.slane %v210_v14, %v226_v12  ;;  %v231_v22 = vrot.slane %v210_v14, %v230_v13 }
  0x13   : > { %v295_v23 = vrot.slane %v210_v14, %v294_v15  ;;  %v299_v24 = vrot.slane %v210_v14, %v298_v16  ;;  %v329_v35 = vrot.slane %v210_v14, %v328_v25  ;;  %v333_v36 = vrot.slane %v210_v14, %v332_v26 }
  0x14   : > { %v271_v29 = vrot.slane %v261_v19, %v260_v10  ;;  %v275_v30 = vrot.slane %v265_v20, %v260_v10  ;;  %v237_v31 = vrot.slane %v227_v21, %v226_v12  ;;  %v241_v32 = vrot.slane %v231_v22, %v226_v12 }
  0x15   : > { %504 = vset.pattern.permute.xlu1 %v535_v5  ;;  %505 = vset.pattern.permute.xlu0 %v535_v5  ;;  %v305_v33 = vrot.slane %v295_v23, %v294_v15  ;;  %v309_v34 = vrot.slane %v299_v24, %v294_v15  ;;  %v339_v45 = vrot.slane %v329_v35, %v328_v25 }
  0x16   : > { %319 = vperm.xlu1 %504, %v211_v0   ;;  %323 = vperm.xlu0 %505, %v212_v3   ;;  %v343_v46 = vrot.slane %v333_v36, %v328_v25 }
  0x1a   : > { %506 = vset.pattern.permute.xlu1 %v533_v2  ;;  %507 = vset.pattern.permute.xlu0 %v533_v2 }
  0x1b   : > { %356 = vperm.xlu1 %506, %v352_v6  }
  0x1f   : > { %361 = vperm.xlu1 %506, %v353_v7  }
  0x87   : > { %v252_v17 = vpop.permute.xlu1 %251  ;;  %v216_v18 = vpop.permute.xlu0 %215 }
  0x88   : > { %v276_v37 = vmul.f32 %v271_v29, %v252_v17  ;;  %v277_v38 = vmul.f32 %v275_v30, %v252_v17  ;;  %v242_v39 = vmul.f32 %v237_v31, %v216_v18  ;;  %v243_v40 = vmul.f32 %v241_v32, %v216_v18 }
  0x8a   : > { %v280_v47 = vadd.f32 %v276_v37, %v242_v39  ;;  %v281_v48 = vadd.f32 %v277_v38, %v243_v40 }
  0x8b   : > { %v256_v27 = vpop.permute.xlu1 %255  ;;  %v221_v28 = vpop.permute.xlu0 %220 }
  0x8c   : > { %v278_v49 = vmul.f32 %v271_v29, %v256_v27  ;;  %v279_v50 = vmul.f32 %v275_v30, %v256_v27  ;;  %v244_v51 = vmul.f32 %v237_v31, %v221_v28  ;;  %v245_v52 = vmul.f32 %v241_v32, %v221_v28 }
  0x8e   : > { %v282_v63 = vadd.f32 %v278_v49, %v244_v51  ;;  %v283_v0 = vadd.f32 %v279_v50, %v245_v52 }
  0x90   : > { %v290_v41 = vpop.permute.xlu1 %289  ;;  %v286_v42 = vpop.permute.xlu0 %285 }
  0x91   : > { %v310_v43 = vmul.f32 %v305_v33, %v286_v42  ;;  %v311_v44 = vmul.f32 %v309_v34, %v286_v42  ;;  %v312_v59 = vmul.f32 %v305_v33, %v290_v41  ;;  %v313_v60 = vmul.f32 %v309_v34, %v290_v41 }
  0x93   : > { %v314_v54 = vadd.f32 %v310_v43, %v280_v47  ;;  %v315_v55 = vadd.f32 %v311_v44, %v281_v48  ;;  %v316_v4 = vadd.f32 %v312_v59, %v282_v63  ;;  %v317_v5 = vadd.f32 %v313_v60, %v283_v0 }
  0x95   : > { %v320_v53 = vpop.permute.xlu1 %319  ;;  %v324_v58 = vpop.permute.xlu0 %323 }
  0x96   : > { %v344_v56 = vmul.f32 %v339_v45, %v320_v53  ;;  %v345_v57 = vmul.f32 %v343_v46, %v320_v53  ;;  %v346_v1 = vmul.f32 %v339_v45, %v324_v58  ;;  %v347_v2 = vmul.f32 %v343_v46, %v324_v58 }
  0x98   : > { %v348_v61 = vadd.f32 %v344_v56, %v314_v54  ;;  %v349_v62 = vadd.f32 %v345_v57, %v315_v55  ;;  %v350_v8 = vadd.f32 %v346_v1, %v316_v4  ;;  %v351_v9 = vadd.f32 %v347_v2, %v317_v5 }
  0x9a   : > { %v357_v3 = vpop.permute.xlu1 %356 }
  0x9b   : > { %v364_v6 = vadd.f32 %v357_v3, %v348_v61  ;;  %v365_v7 = vadd.f32 %v357_v3, %v349_v62 }
  0x9d   : > { %368 = vst [vmem:[%s208_s4] sm:$0xff] %v364_v6  ;;  %369 = vst [vmem:[%s208_s4 + $0x8] sm:$0xff] %v365_v7 }
  0x9e   : > { %v362_v10 = vpop.permute.xlu1 %361 }
  0x9f   : > { %v366_v11 = vadd.f32 %v362_v10, %v350_v8  ;;  %v367_v12 = vadd.f32 %v362_v10, %v351_v9 }
  0xa1   : > { %370 = vst [vmem:[%s208_s4 + $0x10] sm:$0xff] %v366_v11  ;;  %371 = vst [vmem:[%s208_s4 + $0x18] sm:$0xff] %v367_v12 }
  0xa2 PF: > { %s13_s14 = sadd.s32 1, %s530_s14   ;;  %s613_s12 = smov %s526_s13 }
  0xa3   : > { %p10_p5 = scmp.ge.s32.totalorder %s13_s14, 4   ;;  %s614_s13 = smov %s616_s15 }
  0xa5   :  { %12 = sbr.rel (!%p10_p5) target bundleno = 2 (0x2), region = 62 }

</bundles_post_ra>
